<compile_context>
chip_gen: v7x
topology: tpu7x:2x2x1
jax: 0.10.0
libtpu: 0.0.40
codegen_flags: <defaults>
</compile_context>

<pallas_src>
import functools

import jax
import jax.numpy as jnp
from jax.experimental import pallas as pl
from jax.experimental.pallas import tpu as pltpu

NUM_HEADS = 5    # main, short_term, medium_term, long_term, risk
HEAD_PAD = 8     # fused head-projection width (5 heads + 3 zero pad)


# ----------------------------------------------------------------------------
# Pallas kernel: feature_net (Linear->ReLU->Linear->ReLU) + fused heads
# ----------------------------------------------------------------------------
def _critic_kernel(x_ref, w1_ref, b1_ref, w2_ref, b2_ref, wh_ref, bh_ref,
                   q_ref):
    # Layer 1: single fused [tile, K] @ [K, H0] (concat already fused into x).
    h = jnp.dot(x_ref[...], w1_ref[...], preferred_element_type=jnp.float32)
    h = jnp.maximum(h + b1_ref[...], 0.0)            # f32 VPU epilogue

    # Layer 2.
    f = jnp.dot(h.astype(jnp.bfloat16), w2_ref[...],
                preferred_element_type=jnp.float32)
    f = jnp.maximum(f + b2_ref[...], 0.0)

    # All 5 heads fused into one narrow [H1, 8] projection.
    q = jnp.dot(f.astype(jnp.bfloat16), wh_ref[...],
                preferred_element_type=jnp.float32)
    q_ref[...] = q + bh_ref[...]


# ----------------------------------------------------------------------------
# One-time parameter preparation (hoisted out of the per-call path)
# ----------------------------------------------------------------------------
def prepare_params(params):
    """Cast/fuse/pad the module parameters once; reuse across forward calls."""
    bf = jnp.bfloat16
    h1 = params["w2"].shape[1]
    wh_p = (jnp.zeros((h1, HEAD_PAD), jnp.float32)
            .at[:, :NUM_HEADS].set(params["wh"]).astype(bf))
    bh_p = (jnp.zeros((1, HEAD_PAD), jnp.float32)
            .at[0, :NUM_HEADS].set(params["bh"]))
    return {
        "w1": params["w1"].astype(bf),                       # [K, H0]
        "b1": params["b1"].reshape(1, -1).astype(jnp.float32),
        "w2": params["w2"].astype(bf),                       # [H0, H1]
        "b2": params["b2"].reshape(1, -1).astype(jnp.float32),
        "wh": wh_p,                                          # [H1, 8]
        "bh": bh_p,                                          # [1, 8]
    }


def _pick_tile_b(batch):
    """Largest multiple of 128 (<=1024) such that the grid keeps >= 2 steps
    whenever the batch allows it (v7x shards the parallel axis over 2 TCs)."""
    if batch <= 128:
        return 128
    half = -(-batch // 2)                     # ceil(batch / 2)
    tile = ((half + 127) // 128) * 128        # round up to a multiple of 128
    return min(1024, tile)


# ----------------------------------------------------------------------------
# Forward wrapper
# ----------------------------------------------------------------------------
def hierarchical_critic_forward(state, action, prepared, regime=None):
    """Pallas implementation of HierarchicalCriticNetwork.forward.

    Returns (q_value, (q_short, q_medium, q_long), q_regime, risk) with the
    same semantics as the PyTorch module; regime_heads is empty at __init__,
    so q_regime is always None.
    """
    del regime  # TODO(synk): regime_heads is an empty ModuleDict at __init__;
    # the regime-specific head lookup is a no-op, so q_regime is always None.

    B = state.shape[0]
    # Single fused input operand (one XLA op; replaces split weights + 2 pads).
    x = jnp.concatenate([state, action], axis=1).astype(jnp.bfloat16)
    K = x.shape[1]
    h0 = prepared["w1"].shape[1]
    h1 = prepared["w2"].shape[1]

    tile_b = _pick_tile_b(B)
    grid = (pl.cdiv(B, tile_b),)

    const = lambda i: (0, 0)       # weights/biases: VMEM-resident, DMA'd once
    batch_map = lambda i: (i, 0)   # activation stream: tiled over batch

    flops = 2 * B * (K * h0 + h0 * h1 + h1 * HEAD_PAD)
    bytes_accessed = (B * K * 2                               # input read
                      + (K * h0 + h0 * h1 + h1 * HEAD_PAD) * 2  # bf16 weights
                      + (h0 + h1 + HEAD_PAD) * 4                # f32 biases
                      + B * HEAD_PAD * 4)                       # output write

    q_all = pl.pallas_call(
        _critic_kernel,
        out_shape=jax.ShapeDtypeStruct((B, HEAD_PAD), jnp.float32),
        grid=grid,
        in_specs=[
            pl.BlockSpec((tile_b, K), batch_map),     # fused state|action
            pl.BlockSpec((K, h0), const),             # w1 (fused)
            pl.BlockSpec((1, h0), const),             # b1
            pl.BlockSpec((h0, h1), const),            # w2
            pl.BlockSpec((1, h1), const),             # b2
            pl.BlockSpec((h1, HEAD_PAD), const),      # fused heads (narrow)
            pl.BlockSpec((1, HEAD_PAD), const),       # fused head biases
        ],
        out_specs=pl.BlockSpec((tile_b, HEAD_PAD), batch_map),
        compiler_params=pltpu.CompilerParams(
            dimension_semantics=("parallel",)),
        cost_estimate=pl.CostEstimate(flops=flops, transcendentals=0,
                                      bytes_accessed=bytes_accessed),
    )(x, prepared["w1"], prepared["b1"], prepared["w2"], prepared["b2"],
      prepared["wh"], prepared["bh"])

    # NOTE: never reduce over q_all's padded lanes (cols 5..7 are zero heads).
    q_value = q_all[:, 0:1]
    q_short = q_all[:, 1:2]
    q_medium = q_all[:, 2:3]
    q_long = q_all[:, 3:4]
    risk = q_all[:, 4:5]
    q_regime = None
    return q_value, (q_short, q_medium, q_long), q_regime, risk


# ----------------------------------------------------------------------------
# Deterministic parameter init (PyTorch-style uniform(-1/sqrt(fan_in), ..))
# with independent keys for every weight/bias.
# ----------------------------------------------------------------------------
def init_params(key, state_dim, action_dim, hidden_dims=(256, 256)):
    d_in = state_dim + action_dim
    h0, h1 = hidden_dims
    ks = jax.random.split(key, 4 + 2 * NUM_HEADS)

    def uni(k, shape, fan_in):
        bound = 1.0 / jnp.sqrt(float(fan_in))
        return jax.random.uniform(k, shape, jnp.float32, -bound, bound)

    w1 = uni(ks[0], (d_in, h0), d_in)
    b1 = uni(ks[1], (h0,), d_in)
    w2 = uni(ks[2], (h0, h1), h0)
    b2 = uni(ks[3], (h1,), h0)
    head_ws = [uni(ks[4 + i], (h1, 1), h1) for i in range(NUM_HEADS)]
    head_bs = [uni(ks[4 + NUM_HEADS + i], (1,), h1) for i in range(NUM_HEADS)]
    wh = jnp.concatenate(head_ws, axis=1)            # [h1, 5]
    bh = jnp.concatenate(head_bs, axis=0)            # [5]
    return {"w1": w1, "b1": b1, "w2": w2, "b2": b2, "wh": wh, "bh": bh}


# ----------------------------------------------------------------------------
# Pure-JAX reference (mirrors the kernel's bf16-operand / f32-accum math)
# ----------------------------------------------------------------------------
def reference_forward(state, action, params):
    bf = jnp.bfloat16
    x = jnp.concatenate([state, action], axis=1).astype(bf)
    h = jnp.dot(x, params["w1"].astype(bf), preferred_element_type=jnp.float32)
    h = jnp.maximum(h + params["b1"], 0.0)
    f = jnp.dot(h.astype(bf), params["w2"].astype(bf),
                preferred_element_type=jnp.float32)
    f = jnp.maximum(f + params["b2"], 0.0)
    q = jnp.dot(f.astype(bf), params["wh"].astype(bf),
                preferred_element_type=jnp.float32)
    return q + params["bh"]


if __name__ == "__main__":
    key = jax.random.PRNGKey(0)
    k_p, k_s, k_a = jax.random.split(key, 3)

    batch = 4
    state_dim = 16
    action_dim = 8
    hidden_dims = (256, 256)   # module default

    params = init_params(k_p, state_dim, action_dim, hidden_dims)
    prepared = prepare_params(params)
    state = jax.random.normal(k_s, (batch, state_dim), jnp.float32)
    action = jax.random.normal(k_a, (batch, action_dim), jnp.float32)

    forward = jax.jit(hierarchical_critic_forward)
    q_value, (q_short, q_medium, q_long), q_regime, risk = \
        forward(state, action, prepared)
    jax.block_until_ready((q_value, q_short, q_medium, q_long, risk))

    # Sanity check against a matching bf16-operand / f32-accum reference.
    ref = reference_forward(state, action, params)
    got = jnp.concatenate([q_value, q_short, q_medium, q_long, risk], axis=1)
    assert got.shape == (batch, NUM_HEADS)
    assert q_regime is None
    assert jnp.allclose(got, ref, atol=2e-2, rtol=2e-2), "mismatch vs reference"

    print("KERNEL_OK")
</pallas_src>

<mosaic_0001>
module attributes {stable_mosaic.version = 11 : i64} {
  func.func @_critic_kernel(%arg0: i32, %arg1: memref<128x24xbf16, #tpu.memory_space<vmem>>, %arg2: memref<24x256xbf16, #tpu.memory_space<vmem>>, %arg3: memref<1x256xf32, #tpu.memory_space<vmem>>, %arg4: memref<256x256xbf16, #tpu.memory_space<vmem>>, %arg5: memref<1x256xf32, #tpu.memory_space<vmem>>, %arg6: memref<256x8xbf16, #tpu.memory_space<vmem>>, %arg7: memref<1x8xf32, #tpu.memory_space<vmem>>, %arg8: memref<128x8xf32, #tpu.memory_space<vmem>>) attributes {dimension_semantics = [#tpu.dimension_semantics<parallel>], iteration_bounds = array<i64: 1>, scalar_prefetch = 0 : i64, scratch_operands = 0 : i64, tpu.core_type = #tpu.core_type<tc>, window_params = [{transform_indices = @transform_0, window_bounds = array<i64: 128, 24>}, {pipeline_mode = #tpu.pipeline_mode<synchronous>, transform_indices = @transform_1, window_bounds = array<i64: 24, 256>}, {pipeline_mode = #tpu.pipeline_mode<synchronous>, transform_indices = @transform_2, window_bounds = array<i64: 1, 256>}, {pipeline_mode = #tpu.pipeline_mode<synchronous>, transform_indices = @transform_3, window_bounds = array<i64: 256, 256>}, {pipeline_mode = #tpu.pipeline_mode<synchronous>, transform_indices = @transform_4, window_bounds = array<i64: 1, 256>}, {pipeline_mode = #tpu.pipeline_mode<synchronous>, transform_indices = @transform_5, window_bounds = array<i64: 256, 8>}, {pipeline_mode = #tpu.pipeline_mode<synchronous>, transform_indices = @transform_6, window_bounds = array<i64: 1, 8>}, {transform_indices = @transform_7, window_bounds = array<i64: 128, 8>}]} {
    %c0 = arith.constant 0 : index
    %c0_0 = arith.constant 0 : index
    %0 = vector.load %arg1[%c0, %c0_0] : memref<128x24xbf16, #tpu.memory_space<vmem>>, vector<128x24xbf16>
    %c0_1 = arith.constant 0 : index
    %c0_2 = arith.constant 0 : index
    %1 = vector.load %arg2[%c0_1, %c0_2] : memref<24x256xbf16, #tpu.memory_space<vmem>>, vector<24x256xbf16>
    %cst = arith.constant dense<0.000000e+00> : vector<128x256xf32>
    %2 = tpu.matmul %0, %1, %cst {dimension_numbers = #tpu.dot_dimension_numbers<[1], [0], [0], [1], [0, 0, 1, 1], [], []>} : vector<128x24xbf16>, vector<24x256xbf16>, vector<128x256xf32> -> vector<128x256xf32>
    %c0_3 = arith.constant 0 : index
    %c0_4 = arith.constant 0 : index
    %3 = vector.load %arg3[%c0_3, %c0_4] : memref<1x256xf32, #tpu.memory_space<vmem>>, vector<1x256xf32>
    %4 = vector.broadcast %3 : vector<1x256xf32> to vector<128x256xf32>
    %5 = arith.addf %2, %4 : vector<128x256xf32>
    %cst_5 = arith.constant 0.000000e+00 : f32
    %6 = vector.broadcast %cst_5 : f32 to vector<128x256xf32>
    %7 = arith.maximumf %5, %6 : vector<128x256xf32>
    %8 = arith.truncf %7 : vector<128x256xf32> to vector<128x256xbf16>
    %c0_6 = arith.constant 0 : index
    %c0_7 = arith.constant 0 : index
    %9 = vector.load %arg4[%c0_6, %c0_7] : memref<256x256xbf16, #tpu.memory_space<vmem>>, vector<256x256xbf16>
    %cst_8 = arith.constant dense<0.000000e+00> : vector<128x256xf32>
    %10 = tpu.matmul %8, %9, %cst_8 {dimension_numbers = #tpu.dot_dimension_numbers<[1], [0], [0], [1], [0, 0, 1, 1], [], []>} : vector<128x256xbf16>, vector<256x256xbf16>, vector<128x256xf32> -> vector<128x256xf32>
    %c0_9 = arith.constant 0 : index
    %c0_10 = arith.constant 0 : index
    %11 = vector.load %arg5[%c0_9, %c0_10] : memref<1x256xf32, #tpu.memory_space<vmem>>, vector<1x256xf32>
    %12 = vector.broadcast %11 : vector<1x256xf32> to vector<128x256xf32>
    %13 = arith.addf %10, %12 : vector<128x256xf32>
    %cst_11 = arith.constant 0.000000e+00 : f32
    %14 = vector.broadcast %cst_11 : f32 to vector<128x256xf32>
    %15 = arith.maximumf %13, %14 : vector<128x256xf32>
    %16 = arith.truncf %15 : vector<128x256xf32> to vector<128x256xbf16>
    %c0_12 = arith.constant 0 : index
    %c0_13 = arith.constant 0 : index
    %17 = vector.load %arg6[%c0_12, %c0_13] : memref<256x8xbf16, #tpu.memory_space<vmem>>, vector<256x8xbf16>
    %cst_14 = arith.constant dense<0.000000e+00> : vector<128x8xf32>
    %18 = tpu.matmul %16, %17, %cst_14 {dimension_numbers = #tpu.dot_dimension_numbers<[1], [0], [0], [1], [0, 0, 1, 1], [], []>} : vector<128x256xbf16>, vector<256x8xbf16>, vector<128x8xf32> -> vector<128x8xf32>
    %c0_15 = arith.constant 0 : index
    %c0_16 = arith.constant 0 : index
    %19 = vector.load %arg7[%c0_15, %c0_16] : memref<1x8xf32, #tpu.memory_space<vmem>>, vector<1x8xf32>
    %20 = vector.broadcast %19 : vector<1x8xf32> to vector<128x8xf32>
    %21 = arith.addf %18, %20 : vector<128x8xf32>
    %c0_17 = arith.constant 0 : index
    %c0_18 = arith.constant 0 : index
    %22 = vector.load %arg8[%c0_17, %c0_18] : memref<128x8xf32, #tpu.memory_space<vmem>>, vector<128x8xf32>
    tpu.vector_store %arg8[%c0_17, %c0_18], %21 {strides = array<i32>} : memref<128x8xf32, #tpu.memory_space<vmem>>, vector<128x8xf32>,
    return
  }
  func.func @transform_0(%arg0: i32) -> (i32, i32) {
    %c0_i32 = arith.constant 0 : i32
    %c0_i32_0 = arith.constant 0 : i32
    return %arg0, %c0_i32 : i32, i32
  }
  func.func @transform_1(%arg0: i32) -> (i32, i32) {
    %c0_i32 = arith.constant 0 : i32
    %c0_i32_0 = arith.constant 0 : i32
    %c0_i32_1 = arith.constant 0 : i32
    return %c0_i32, %c0_i32_0 : i32, i32
  }
  func.func @transform_2(%arg0: i32) -> (i32, i32) {
    %c0_i32 = arith.constant 0 : i32
    %c0_i32_0 = arith.constant 0 : i32
    %c0_i32_1 = arith.constant 0 : i32
    return %c0_i32, %c0_i32_0 : i32, i32
  }
  func.func @transform_3(%arg0: i32) -> (i32, i32) {
    %c0_i32 = arith.constant 0 : i32
    %c0_i32_0 = arith.constant 0 : i32
    %c0_i32_1 = arith.constant 0 : i32
    return %c0_i32, %c0_i32_0 : i32, i32
  }
  func.func @transform_4(%arg0: i32) -> (i32, i32) {
    %c0_i32 = arith.constant 0 : i32
    %c0_i32_0 = arith.constant 0 : i32
    %c0_i32_1 = arith.constant 0 : i32
    return %c0_i32, %c0_i32_0 : i32, i32
  }
  func.func @transform_5(%arg0: i32) -> (i32, i32) {
    %c0_i32 = arith.constant 0 : i32
    %c0_i32_0 = arith.constant 0 : i32
    %c0_i32_1 = arith.constant 0 : i32
    return %c0_i32, %c0_i32_0 : i32, i32
  }
  func.func @transform_6(%arg0: i32) -> (i32, i32) {
    %c0_i32 = arith.constant 0 : i32
    %c0_i32_0 = arith.constant 0 : i32
    %c0_i32_1 = arith.constant 0 : i32
    return %c0_i32, %c0_i32_0 : i32, i32
  }
  func.func @transform_7(%arg0: i32) -> (i32, i32) {
    %c0_i32 = arith.constant 0 : i32
    %c0_i32_0 = arith.constant 0 : i32
    return %arg0, %c0_i32 : i32, i32
  }
}

</mosaic_0001>

<bundles_post_ra>
// kernel: hierarchical_critic_forward.1
= control target key start
LH: loop header
LB: loop body
LE: loop exit
PB: predicated region body
PF: predicated region fallthrough
CT: control target
= control target key end

     0   :  { %12 = vsyncpa [#allocation3], 0  ;;  %s1342_s24 = smov [#allocation2]   ;;  %s1685_s0 = inlined_call_operand.vmem [shape: bf16[4,24], index: 0, kind: input, shape index: {}]   ;;  %s1686_s1 = inlined_call_operand.vmem [shape: bf16[24,256], index: 1, kind: input, shape index: {}]   ;;  %s1687_s2 = inlined_call_operand.vmem [shape: f32[1,256], index: 2, kind: input, shape index: {}]   ;;  %s1688_s3 = inlined_call_operand.hbm [shape: bf16[256,256], index: 3, kind: input, shape index: {}]   ;;  %s1689_s4 = inlined_call_operand.vmem [shape: f32[1,256], index: 4, kind: input, shape index: {}]   ;;  %s1690_s5 = inlined_call_operand.vmem [shape: bf16[256,8], index: 5, kind: input, shape index: {}]   ;;  %s1691_s6 = inlined_call_operand.vmem [shape: f32[1,8], index: 6, kind: input, shape index: {}]   ;;  %s1692_s7 = inlined_call_operand.vmem [shape: f32[4,8], index: 7, kind: output, shape index: {}]  }
   0x1   :  { %s24_s25 = sshll.u32 %s1342_s24, 4  ;;  %s1318_s28 = scalar_lea.hbm %s1688_s3, 4096  ;;  %s25_s25 = int_to_ptr.vmem [resolvable:$true] %s24_s25 }
   0x2   :  { %p1319_p0 = scmp.ne.s32.totalorder %s1688_s3, %s1318_s28  ;;  %p1322_p1 = scmp.lt.u32.totalorder %s1318_s28, %s1688_s3 }
   0x4   :  { %p1324_p2 = pnand %p1322_p1, %p1319_p0 }
   0x6   :  { %1327 = shalt.err (!%p1324_p2)
}
   0x7   :  { %s1328_s10 = scalar_lea.vmem %s25_s25, 4096  ;;  %p1333_p4 = scmp.lt.s32.totalorder %s25_s25, %s25_s25 }
   0x8   :  { %p1329_p3 = scmp.ne.s32.totalorder %s25_s25, %s1328_s10  ;;  %p1334_p5 = scmp.lt.s32.totalorder %s1328_s10, %s1328_s10 }
   0xa   :  { %p1335_p6 = por %p1334_p5, %p1333_p4 }
   0xc   :  { %p1336_p7 = pnand %p1335_p6, %p1329_p3 }
   0xe   :  { %1339 = shalt.err (!%p1336_p7)
}
   0xf   :  { %s1343_s11 = smov 128   ;;  %s1344_s12 = smov 8  }
  0x10   :  { %30 = dma.hbm_to_vmem [thread:$0]  %s1688_s3, 4096, %s25_s25, [#allocation3], %s1343_s11, %s1343_s11, %s1344_s12  }
  0x11   :  { %1340 = dma.done.wait [#allocation3], 4096  }
  0x12   :  { %1341 = vsyncadd [#allocation3], 4294963200  ;;  %v78_v0 = vlaneseq  ;;  %v1345_v1 = vmov 0   ;;  %v1346_v2 = vmov 1983009808   ;;  %v75_v8 = vld [vmem:[%s1686_s1 + $0x10] sm:$0xff] }
  0x13   :  { %335 = vmatprep.mubr.bf16.mxu0 %v1345_v1  ;;  %v123_v3 = vunpack.c.l.s4 %v1346_v2  ;;  %v1249_v6 = vld [vmem:[%s1686_s1 + $0x4] ss:$8 sps:$4 sm:$0xff]   ;;  %v1251_v7 = vld [vmem:[%s1686_s1] ss:$8 sps:$4 sm:$0xff]   ;;  %vm296_vm0 = vcmask 1043456   ;;  %v1121_v11 = vcombine.high %v75_v8, %v75_v8  ;;  %v1120_v12 = vcombine.low %v75_v8, %v75_v8 }
  0x14   :  { %v1400_v4 = vshrl.u32 %v78_v0, 7  ;;  %v41_v9 = vld [vmem:[%s1685_s0] sm:$0x3]  ;;  %303 = vmatprep.subr.bf16.mxu0 %v1249_v6  ;;  %v42_v13 = vld [vmem:[%s1685_s0 + $0x2] sm:$0x3]  ;;  %vm271_vm1 = vcmask 195584  }
  0x15   :  { %v124_v5 = vunpack.c.0.s8 %v123_v3  ;;  %v43_v14 = vld [vmem:[%s1685_s0 + $0x4] sm:$0x3]  ;;  %v44_v15 = vld [vmem:[%s1685_s0 + $0x6] sm:$0x3]  ;;  %304 = vmatpush1.bf16.msra.mxu0 %v1251_v7  ;;  %v120_v16 = vcombine.low %v41_v9, %v42_v13  ;;  %v45_v18 = vld [vmem:[%s1685_s0 + $0x8] sm:$0x3] }
  0x16   :  { %v121_v17 = vcombine.low %v43_v14, %v44_v15  ;;  %v46_v19 = vld [vmem:[%s1685_s0 + $0xa] sm:$0x3]  ;;  %v47_v20 = vld [vmem:[%s1685_s0 + $0xc] sm:$0x3]  ;;  %1122 = vmatprep.subr.msk.bf16.mxu0 %vm296_vm0, %v1121_v11  ;;  %v298_v21 = vsel %vm296_vm0, %v1120_v12, 0  ;;  %vm1061_vm2 = vcmask 64512  }
  0x17   :  { %v1415_v10 = vsub.s32 %v124_v5, %v1400_v4  ;;  %v48_v22 = vld [vmem:[%s1685_s0 + $0xe] sm:$0x3]  ;;  %v137_v25 = vcombine.low %v45_v18, %v46_v19  ;;  %v49_v30 = vld [vmem:[%s1685_s0 + $0x10] sm:$0x3]  ;;  %v50_v31 = vld [vmem:[%s1685_s0 + $0x12] sm:$0x3] }
  0x18   :  { %v138_v26 = vcombine.low %v47_v20, %v48_v22  ;;  %v51_v32 = vld [vmem:[%s1685_s0 + $0x14] sm:$0x3]  ;;  %v52_v33 = vld [vmem:[%s1685_s0 + $0x16] sm:$0x3]  ;;  %v1254_v34 = vld [vmem:[#allocation2 + $0x4] ss:$8 sps:$4 sm:$0xff]   ;;  %v154_v37 = vcombine.low %v49_v30, %v50_v31 }
  0x19   :  { %v128_v23 = vrot.slane %v120_v16, %v1415_v10  ;;  %v135_v24 = vrot.slane %v121_v17, %v1415_v10  ;;  %306 = vmatpush1.bf16.msra.mxu0 %v298_v21  ;;  %v145_v28 = vrot.slane %v137_v25, %v1415_v10  ;;  %v1256_v35 = vld [vmem:[#allocation2] ss:$8 sps:$4 sm:$0xff]   ;;  %v155_v38 = vcombine.low %v51_v32, %v52_v33  ;;  %v1257_v39 = vld [vmem:[#allocation2 + $0x14] ss:$8 sps:$4 sm:$0xff]   ;;  %v1259_v40 = vld [vmem:[#allocation2 + $0x10] ss:$8 sps:$4 sm:$0xff]  }
  0x1a   :  { %v152_v29 = vrot.slane %v138_v26, %v1415_v10  ;;  %668 = vmatprep.subr.bf16.mxu1 %v1254_v34  ;;  %v53_v41 = vld [vmem:[%s1685_s0 + $0x18] sm:$0x3]  ;;  %v1260_v42 = vld [vmem:[#allocation2 + $0x24] ss:$8 sps:$4 sm:$0xff]   ;;  %v162_v43 = vrot.slane %v154_v37, %v1415_v10  ;;  %v54_v45 = vld [vmem:[%s1685_s0 + $0x1a] sm:$0x3] }
  0x1b   :  { %v136_v27 = vcombine.low %v128_v23, %v135_v24  ;;  %669 = vmatpush1.bf16.msra.mxu1 %v1256_v35  ;;  %v169_v44 = vrot.slane %v155_v38, %v1415_v10  ;;  %v55_v46 = vld [vmem:[%s1685_s0 + $0x1c] sm:$0x3]  ;;  %v56_v47 = vld [vmem:[%s1685_s0 + $0x1e] sm:$0x3]  ;;  %v1262_v48 = vld [vmem:[#allocation2 + $0x20] ss:$8 sps:$4 sm:$0xff]   ;;  %v171_v51 = vcombine.low %v53_v41, %v54_v45 }
  0x1c   :  { %v153_v36 = vcombine.low %v145_v28, %v152_v29  ;;  %670 = vmatprep.subr.bf16.mxu1 %v1257_v39  ;;  %v1263_v49 = vld [vmem:[#allocation2 + $0x34] ss:$8 sps:$4 sm:$0xff]   ;;  %v172_v52 = vcombine.low %v55_v46, %v56_v47  ;;  %v1265_v53 = vld [vmem:[#allocation2 + $0x30] ss:$8 sps:$4 sm:$0xff]   ;;  %v57_v54 = vld [vmem:[%s1685_s0 + $0x20] sm:$0x3] }
  0x1d   :  { %1123 = vmatmul.mubr.msk.bf16.vlgmr.msra.gmra.mrb[0].mxu0 %vm271_vm1, %v136_v27  ;;  %v170_v50 = vcombine.low %v162_v43, %v169_v44  ;;  %v1266_v55 = vld [vmem:[#allocation2 + $0x44] ss:$8 sps:$4 sm:$0xff]   ;;  %v179_v56 = vrot.slane %v171_v51, %v1415_v10  ;;  %v58_v58 = vld [vmem:[%s1685_s0 + $0x22] sm:$0x3]  ;;  %v1269_v62 = vld [vmem:[#allocation2 + $0x54] ss:$8 sps:$4 sm:$0xff]  }
  0x1e   :  { %345 = vmatprep.mubr.bf16.mxu0 %v1345_v1  ;;  %v186_v57 = vrot.slane %v172_v52, %v1415_v10  ;;  %v59_v59 = vld [vmem:[%s1685_s0 + $0x24] sm:$0x3]  ;;  %v60_v60 = vld [vmem:[%s1685_s0 + $0x26] sm:$0x3]  ;;  %v1268_v61 = vld [vmem:[#allocation2 + $0x40] ss:$8 sps:$4 sm:$0xff]   ;;  %v188_v0 = vcombine.low %v57_v54, %v58_v58 }
  0x1f   :  { %671 = vmatpush1.bf16.msra.mxu1 %v1259_v40  ;;  %v189_v2 = vcombine.low %v59_v59, %v60_v60  ;;  %v1271_v3 = vld [vmem:[#allocation2 + $0x50] ss:$8 sps:$4 sm:$0xff]   ;;  %v1272_v5 = vld [vmem:[#allocation2 + $0x64] ss:$8 sps:$4 sm:$0xff]   ;;  %v61_v6 = vld [vmem:[%s1685_s0 + $0x28] sm:$0x3] }
  0x20   :  { %672 = vmatprep.subr.bf16.mxu1 %v1260_v42  ;;  %v187_v63 = vcombine.low %v179_v56, %v186_v57  ;;  %v62_v7 = vld [vmem:[%s1685_s0 + $0x2a] sm:$0x3]  ;;  %v63_v8 = vld [vmem:[%s1685_s0 + $0x2c] sm:$0x3]  ;;  %v64_v9 = vld [vmem:[%s1685_s0 + $0x2e] sm:$0x3]  ;;  %v196_v11 = vrot.slane %v188_v0, %v1415_v10 }
  0x21   :  { %v203_v12 = vrot.slane %v189_v2, %v1415_v10  ;;  %v1274_v13 = vld [vmem:[#allocation2 + $0x60] ss:$8 sps:$4 sm:$0xff]   ;;  %v1275_v14 = vld [vmem:[#allocation2 + $0x74] ss:$8 sps:$4 sm:$0xff]   ;;  %v205_v16 = vcombine.low %v61_v6, %v62_v7  ;;  %v206_v17 = vcombine.low %v63_v8, %v64_v9  ;;  %v1277_v18 = vld [vmem:[#allocation2 + $0x70] ss:$8 sps:$4 sm:$0xff]  }
  0x22   :  { %v1278_v19 = vld [vmem:[#allocation2 + $0x84] ss:$8 sps:$4 sm:$0xff]   ;;  %v65_v20 = vld [vmem:[%s1685_s0 + $0x30] sm:$0x3]  ;;  %v66_v23 = vld [vmem:[%s1685_s0 + $0x32] sm:$0x3] }
  0x23   :  { %673 = vmatpush1.bf16.msra.mxu1 %v1262_v48  ;;  %v204_v15 = vcombine.low %v196_v11, %v203_v12  ;;  %v213_v21 = vrot.slane %v205_v16, %v1415_v10  ;;  %v220_v22 = vrot.slane %v206_v17, %v1415_v10  ;;  %v67_v24 = vld [vmem:[%s1685_s0 + $0x34] sm:$0x3]  ;;  %v68_v25 = vld [vmem:[%s1685_s0 + $0x36] sm:$0x3]  ;;  %v1280_v26 = vld [vmem:[#allocation2 + $0x80] ss:$8 sps:$4 sm:$0xff]   ;;  %v222_v29 = vcombine.low %v65_v20, %v66_v23 }
  0x24   :  { %674 = vmatprep.subr.bf16.mxu1 %v1263_v49  ;;  %v1281_v27 = vld [vmem:[#allocation2 + $0x94] ss:$8 sps:$4 sm:$0xff]   ;;  %v223_v30 = vcombine.low %v67_v24, %v68_v25  ;;  %v1283_v31 = vld [vmem:[#allocation2 + $0x90] ss:$8 sps:$4 sm:$0xff]   ;;  %v1284_v32 = vld [vmem:[#allocation2 + $0xa4] ss:$8 sps:$4 sm:$0xff]  }
  0x25   :  { %1124 = vmatmul.mubr.msk.bf16.gmra.mrb[4].mxu0 %vm271_vm1, %v153_v36  ;;  %v221_v28 = vcombine.low %v213_v21, %v220_v22  ;;  %v230_v33 = vrot.slane %v222_v29, %v1415_v10  ;;  %v69_v35 = vld [vmem:[%s1685_s0 + $0x38] sm:$0x3]  ;;  %v70_v36 = vld [vmem:[%s1685_s0 + $0x3a] sm:$0x3]  ;;  %v71_v37 = vld [vmem:[%s1685_s0 + $0x3c] sm:$0x3] }
  0x26   :  { %355 = vmatprep.mubr.bf16.mxu0 %v1345_v1  ;;  %v237_v34 = vrot.slane %v223_v30, %v1415_v10  ;;  %v72_v38 = vld [vmem:[%s1685_s0 + $0x3e] sm:$0x3]  ;;  %v1286_v39 = vld [vmem:[#allocation2 + $0xa0] ss:$8 sps:$4 sm:$0xff]   ;;  %v239_v42 = vcombine.low %v69_v35, %v70_v36  ;;  %v1289_v44 = vld [vmem:[#allocation2 + $0xb0] ss:$8 sps:$4 sm:$0xff]  }
  0x27   :  { %675 = vmatpush1.bf16.msra.mxu1 %v1265_v53  ;;  %v1287_v40 = vld [vmem:[#allocation2 + $0xb4] ss:$8 sps:$4 sm:$0xff]   ;;  %v240_v43 = vcombine.low %v71_v37, %v72_v38  ;;  %v1290_v45 = vld [vmem:[#allocation2 + $0xc4] ss:$8 sps:$4 sm:$0xff]   ;;  %v1292_v48 = vld [vmem:[#allocation2 + $0xc0] ss:$8 sps:$4 sm:$0xff]  }
  0x28   :  { %676 = vmatprep.subr.bf16.mxu1 %v1266_v55  ;;  %v238_v41 = vcombine.low %v230_v33, %v237_v34  ;;  %v247_v46 = vrot.slane %v239_v42, %v1415_v10  ;;  %v1293_v49 = vld [vmem:[#allocation2 + $0xd4] ss:$8 sps:$4 sm:$0xff]   ;;  %v1295_v51 = vld [vmem:[#allocation2 + $0xd0] ss:$8 sps:$4 sm:$0xff]   ;;  %v1296_v52 = vld [vmem:[#allocation2 + $0xe4] ss:$8 sps:$4 sm:$0xff]  }
  0x29   :  { %v254_v47 = vrot.slane %v240_v43, %v1415_v10  ;;  %v1298_v53 = vld [vmem:[#allocation2 + $0xe0] ss:$8 sps:$4 sm:$0xff]   ;;  %v1299_v54 = vld [vmem:[#allocation2 + $0xf4] ss:$8 sps:$4 sm:$0xff]   ;;  %v1301_v55 = vld [vmem:[#allocation2 + $0xf0] ss:$8 sps:$4 sm:$0xff]  }
  0x2a   :  { %v1303_v10 = vld [vmem:[%s1690_s5] sm:$0xff]   ;;  %v1304_v56 = vld [vmem:[%s1690_s5 + $0x48] sm:$0xff]   ;;  %v1306_v58 = vld [vmem:[%s1690_s5 + $0x50] sm:$0xff]   ;;  %v80_v6 = vsub.s32 0, %v1400_v4  ;;  %v84_v8 = vsub.s32 1, %v1400_v4 }
  0x2b   :  { %677 = vmatpush1.bf16.msra.mxu1 %v1268_v61  ;;  %v1305_v57 = vld [vmem:[%s1690_s5 + $0x8] sm:$0xff]   ;;  %v1307_v59 = vld [vmem:[%s1690_s5 + $0x10] sm:$0xff]   ;;  %v1308_v60 = vld [vmem:[%s1690_s5 + $0x58] sm:$0xff]  }
  0x2c   :  { %678 = vmatprep.subr.bf16.mxu1 %v1269_v62  ;;  %v1309_v61 = vld [vmem:[%s1690_s5 + $0x18] sm:$0xff]   ;;  %v1310_v62 = vld [vmem:[%s1690_s5 + $0x60] sm:$0xff]   ;;  %v1312_v0 = vld [vmem:[%s1690_s5 + $0x68] sm:$0xff]  }
  0x2d   :  { %1125 = vmatmul.mubr.msk.bf16.gmra.mrb[8].mxu0 %vm271_vm1, %v170_v50  ;;  %v255_v50 = vcombine.low %v247_v46, %v254_v47  ;;  %v1313_v2 = vld [vmem:[%s1690_s5 + $0x28] sm:$0xff]   ;;  %v76_v7 = vld [vmem:[%s1687_s2] sm:$0x3] }
  0x2e   :  { %365 = vmatprep.mubr.bf16.mxu0 %v1345_v1  ;;  %v1592_v9 = vrot.slane %v76_v7, %v80_v6  ;;  %v1596_v11 = vrot.slane %v76_v7, %v84_v8 }
  0x2f   :  { %679 = vmatpush1.bf16.msra.mxu1 %v1271_v3  ;;  %v1314_v3 = vld [vmem:[%s1690_s5 + $0x70] sm:$0xff]  }
  0x30   :  { %680 = vmatprep.subr.bf16.mxu1 %v1272_v5  ;;  %v1315_v5 = vld [vmem:[%s1690_s5 + $0x30] sm:$0xff]  }
  0x33   :  { %681 = vmatpush1.bf16.msra.mxu1 %v1274_v13 }
  0x34   :  { %682 = vmatprep.subr.bf16.mxu1 %v1275_v14 }
  0x35   :  { %1126 = vmatmul.mubr.msk.bf16.gmra.mrb[12].mxu0 %vm271_vm1, %v187_v63  ;;  %v1311_v63 = vld [vmem:[%s1690_s5 + $0x20] sm:$0xff]  }
  0x36   :  { %375 = vmatprep.mubr.bf16.mxu0 %v1345_v1 }
  0x37   :  { %683 = vmatpush1.bf16.msra.mxu1 %v1277_v18 }
  0x38   :  { %684 = vmatprep.subr.bf16.mxu1 %v1278_v19 }
  0x3b   :  { %685 = vmatpush1.bf16.msra.mxu1 %v1280_v26 }
  0x3c   :  { %686 = vmatprep.subr.bf16.mxu1 %v1281_v27 }
  0x3d   :  { %1127 = vmatmul.mubr.msk.bf16.gmra.mrb[16].mxu0 %vm271_vm1, %v204_v15 }
  0x3e   :  { %385 = vmatprep.mubr.bf16.mxu0 %v1345_v1 }
  0x3f   :  { %687 = vmatpush1.bf16.msra.mxu1 %v1283_v31 }
  0x40   :  { %688 = vmatprep.subr.bf16.mxu1 %v1284_v32 }
  0x43   :  { %689 = vmatpush1.bf16.msra.mxu1 %v1286_v39 }
  0x44   :  { %690 = vmatprep.subr.bf16.mxu1 %v1287_v40 }
  0x45   :  { %1128 = vmatmul.mubr.msk.bf16.gmra.mrb[20].mxu0 %vm271_vm1, %v221_v28 }
  0x46   :  { %395 = vmatprep.mubr.bf16.mxu0 %v1345_v1 }
  0x47   :  { %691 = vmatpush1.bf16.msra.mxu1 %v1289_v44 }
  0x48   :  { %692 = vmatprep.subr.bf16.mxu1 %v1290_v45 }
  0x4b   :  { %693 = vmatpush1.bf16.msra.mxu1 %v1292_v48 }
  0x4c   :  { %694 = vmatprep.subr.bf16.mxu1 %v1293_v49 }
  0x4d   :  { %1129 = vmatmul.mubr.msk.bf16.gmra.mrb[24].mxu0 %vm271_vm1, %v238_v41 }
  0x4e   :  { %405 = vmatprep.mubr.bf16.mxu0 %v1345_v1  ;;  %v1302_v1 = vld [vmem:[%s1690_s5 + $0x40] sm:$0xff]  }
  0x4f   :  { %695 = vmatpush1.bf16.msra.mxu1 %v1295_v51  ;;  %1180 = vmatprep.subr.bf16.mxu0 %v1302_v1 }
  0x50   :  { %696 = vmatprep.subr.bf16.mxu1 %v1296_v52  ;;  %1181 = vmatpush3.bf16.msra.mxu0 %v1303_v10 }
  0x51   :  { %1182 = vmatprep.subr.bf16.mxu0 %v1304_v56 }
  0x53   :  { %697 = vmatpush1.bf16.msra.mxu1 %v1298_v53 }
  0x54   :  { %698 = vmatprep.subr.bf16.mxu1 %v1299_v54  ;;  %1183 = vmatpush3.bf16.msra.mxu0 %v1305_v57 }
  0x55   :  { %1130 = vmatmul.mubr.msk.bf16.gmra.mrb[28].mxu0 %vm271_vm1, %v255_v50  ;;  %1184 = vmatprep.subr.bf16.mxu0 %v1306_v58 }
  0x57   :  { %699 = vmatpush1.bf16.msra.mxu1 %v1301_v55 }
  0x58   :  { %1185 = vmatpush3.bf16.msra.mxu0 %v1307_v59 }
  0x59   :  { %1186 = vmatprep.subr.bf16.mxu0 %v1308_v60 }
  0x5c   :  { %1187 = vmatpush3.bf16.msra.mxu0 %v1309_v61 }
  0x5d   :  { %1188 = vmatprep.subr.bf16.mxu0 %v1310_v62 }
  0x60   :  { %1189 = vmatpush3.bf16.msra.mxu0 %v1311_v63 }
  0x61   :  { %1190 = vmatprep.subr.bf16.mxu0 %v1312_v0 }
  0x64   :  { %1191 = vmatpush3.bf16.msra.mxu0 %v1313_v2 }
  0x65   :  { %1192 = vmatprep.subr.bf16.mxu0 %v1314_v3 }
  0x68   :  { %1193 = vmatpush3.bf16.msra.mxu0 %v1315_v5 }
  0xf0   :  { %v337_v12 = vpop.f32.mrb[0].mxu0 }
  0xf1   :  { %v338_v13 = vadd.f32 %v337_v12, %v1592_v9  ;;  %v339_v14 = vpop.f32.mrb[1].mxu0 }
  0xf2   :  { %v340_v15 = vadd.f32 %v339_v14, %v1596_v11  ;;  %v341_v16 = vpop.f32.mrb[2].mxu0 }
  0xf3   :  { %v342_v17 = vadd.f32 %v341_v16, %v1592_v9  ;;  %v343_v18 = vpop.f32.mrb[3].mxu0  ;;  %v416_v20 = vmax.f32 %v338_v13, 0.0 }
  0xf4   :  { %v344_v19 = vadd.f32 %v343_v18, %v1596_v11  ;;  %v417_v22 = vmax.f32 %v340_v15, 0.0 }
  0xf5   :  { %v418_v21 = vmax.f32 %v342_v17, 0.0 }
  0xf6   :  { %v419_v23 = vmax.f32 %v344_v19, 0.0 }
  0xf7   :  { %v448_v24 = vpack.c.bf16 %v418_v21, %v416_v20 }
  0xf8   :  { %v347_v25 = vpop.f32.mrb[4].mxu0  ;;  %v449_v26 = vpack.c.bf16 %v419_v23, %v417_v22 }
  0xf9   :  { %v348_v27 = vadd.f32 %v347_v25, %v1592_v9  ;;  %v349_v28 = vpop.f32.mrb[5].mxu0 }
  0xfa   :  { %v350_v29 = vadd.f32 %v349_v28, %v1596_v11  ;;  %v351_v30 = vpop.f32.mrb[6].mxu0  ;;  %700 = vmatprep.mubr.bf16.mxu1 %v449_v26 }
  0xfb   :  { %v352_v31 = vadd.f32 %v351_v30, %v1592_v9  ;;  %v353_v32 = vpop.f32.mrb[7].mxu0  ;;  %701 = vmatmul.mubr.bf16.vlgmr.msra.gmra.mrb[0].mxu1 %v448_v24  ;;  %v420_v34 = vmax.f32 %v348_v27, 0.0 }
  0xfc   :  { %v354_v33 = vadd.f32 %v353_v32, %v1596_v11  ;;  %v421_v36 = vmax.f32 %v350_v29, 0.0 }
  0xfd   :  { %v422_v35 = vmax.f32 %v352_v31, 0.0 }
  0xfe   :  { %v423_v37 = vmax.f32 %v354_v33, 0.0 }
  0xff   :  { %v450_v38 = vpack.c.bf16 %v422_v35, %v420_v34 }
 0x100   :  { %v451_v39 = vpack.c.bf16 %v423_v37, %v421_v36  ;;  %v357_v40 = vpop.f32.mrb[8].mxu0 }
 0x101   :  { %v358_v41 = vadd.f32 %v357_v40, %v1592_v9  ;;  %v359_v42 = vpop.f32.mrb[9].mxu0 }
 0x102   :  { %v360_v43 = vadd.f32 %v359_v42, %v1596_v11  ;;  %v361_v44 = vpop.f32.mrb[10].mxu0  ;;  %710 = vmatprep.mubr.bf16.mxu1 %v451_v39 }
 0x103   :  { %v362_v45 = vadd.f32 %v361_v44, %v1592_v9  ;;  %v363_v46 = vpop.f32.mrb[11].mxu0  ;;  %711 = vmatmul.mubr.bf16.gmra.mrb[4].mxu1 %v450_v38  ;;  %v424_v48 = vmax.f32 %v358_v41, 0.0 }
 0x104   :  { %v364_v47 = vadd.f32 %v363_v46, %v1596_v11  ;;  %v425_v50 = vmax.f32 %v360_v43, 0.0 }
 0x105   :  { %v426_v49 = vmax.f32 %v362_v45, 0.0 }
 0x106   :  { %v427_v51 = vmax.f32 %v364_v47, 0.0 }
 0x107   :  { %v452_v52 = vpack.c.bf16 %v426_v49, %v424_v48 }
 0x108   :  { %v453_v53 = vpack.c.bf16 %v427_v51, %v425_v50  ;;  %v367_v54 = vpop.f32.mrb[12].mxu0 }
 0x109   :  { %v368_v55 = vadd.f32 %v367_v54, %v1592_v9  ;;  %v369_v1 = vpop.f32.mrb[13].mxu0 }
 0x10a   :  { %v370_v10 = vadd.f32 %v369_v1, %v1596_v11  ;;  %v371_v56 = vpop.f32.mrb[14].mxu0  ;;  %720 = vmatprep.mubr.bf16.mxu1 %v453_v53 }
 0x10b   :  { %v372_v57 = vadd.f32 %v371_v56, %v1592_v9  ;;  %v373_v58 = vpop.f32.mrb[15].mxu0  ;;  %721 = vmatmul.mubr.bf16.gmra.mrb[8].mxu1 %v452_v52  ;;  %v428_v60 = vmax.f32 %v368_v55, 0.0 }
 0x10c   :  { %v374_v59 = vadd.f32 %v373_v58, %v1596_v11  ;;  %v429_v62 = vmax.f32 %v370_v10, 0.0 }
 0x10d   :  { %v430_v61 = vmax.f32 %v372_v57, 0.0 }
 0x10e   :  { %v431_v63 = vmax.f32 %v374_v59, 0.0 }
 0x10f   :  { %v454_v0 = vpack.c.bf16 %v430_v61, %v428_v60 }
 0x110   :  { %v455_v2 = vpack.c.bf16 %v431_v63, %v429_v62  ;;  %v377_v3 = vpop.f32.mrb[16].mxu0  ;;  %v1316_v63 = vld [vmem:[%s1690_s5 + $0x78] sm:$0xff]  }
 0x111   :  { %v378_v5 = vadd.f32 %v377_v3, %v1592_v9  ;;  %v379_v7 = vpop.f32.mrb[17].mxu0  ;;  %1194 = vmatprep.subr.bf16.mxu0 %v1316_v63 }
 0x112   :  { %v380_v12 = vadd.f32 %v379_v7, %v1596_v11  ;;  %v381_v13 = vpop.f32.mrb[18].mxu0  ;;  %730 = vmatprep.mubr.bf16.mxu1 %v455_v2 }
 0x113   :  { %v382_v14 = vadd.f32 %v381_v13, %v1592_v9  ;;  %v383_v15 = vpop.f32.mrb[19].mxu0  ;;  %731 = vmatmul.mubr.bf16.gmra.mrb[12].mxu1 %v454_v0  ;;  %v432_v17 = vmax.f32 %v378_v5, 0.0 }
 0x114   :  { %v384_v16 = vadd.f32 %v383_v15, %v1596_v11  ;;  %v433_v19 = vmax.f32 %v380_v12, 0.0 }
 0x115   :  { %v434_v18 = vmax.f32 %v382_v14, 0.0 }
 0x116   :  { %v435_v20 = vmax.f32 %v384_v16, 0.0 }
 0x117   :  { %v456_v21 = vpack.c.bf16 %v434_v18, %v432_v17 }
 0x118   :  { %v457_v22 = vpack.c.bf16 %v435_v20, %v433_v19  ;;  %v387_v23 = vpop.f32.mrb[20].mxu0 }
 0x119   :  { %v388_v24 = vadd.f32 %v387_v23, %v1592_v9  ;;  %v389_v25 = vpop.f32.mrb[21].mxu0 }
 0x11a   :  { %v390_v26 = vadd.f32 %v389_v25, %v1596_v11  ;;  %v391_v27 = vpop.f32.mrb[22].mxu0  ;;  %740 = vmatprep.mubr.bf16.mxu1 %v457_v22 }
 0x11b   :  { %v392_v28 = vadd.f32 %v391_v27, %v1592_v9  ;;  %v393_v29 = vpop.f32.mrb[23].mxu0  ;;  %741 = vmatmul.mubr.bf16.gmra.mrb[16].mxu1 %v456_v21  ;;  %v436_v31 = vmax.f32 %v388_v24, 0.0 }
 0x11c   :  { %v394_v30 = vadd.f32 %v393_v29, %v1596_v11  ;;  %v437_v33 = vmax.f32 %v390_v26, 0.0 }
 0x11d   :  { %v438_v32 = vmax.f32 %v392_v28, 0.0 }
 0x11e   :  { %v439_v34 = vmax.f32 %v394_v30, 0.0 }
 0x11f   :  { %v458_v35 = vpack.c.bf16 %v438_v32, %v436_v31 }
 0x120   :  { %v459_v36 = vpack.c.bf16 %v439_v34, %v437_v33  ;;  %v397_v37 = vpop.f32.mrb[24].mxu0 }
 0x121   :  { %v398_v38 = vadd.f32 %v397_v37, %v1592_v9  ;;  %v399_v39 = vpop.f32.mrb[25].mxu0 }
 0x122   :  { %v400_v40 = vadd.f32 %v399_v39, %v1596_v11  ;;  %v401_v41 = vpop.f32.mrb[26].mxu0  ;;  %750 = vmatprep.mubr.bf16.mxu1 %v459_v36 }
 0x123   :  { %v402_v42 = vadd.f32 %v401_v41, %v1592_v9  ;;  %v403_v43 = vpop.f32.mrb[27].mxu0  ;;  %751 = vmatmul.mubr.bf16.gmra.mrb[20].mxu1 %v458_v35  ;;  %v440_v45 = vmax.f32 %v398_v38, 0.0 }
 0x124   :  { %v404_v44 = vadd.f32 %v403_v43, %v1596_v11  ;;  %v441_v47 = vmax.f32 %v400_v40, 0.0 }
 0x125   :  { %v442_v46 = vmax.f32 %v402_v42, 0.0 }
 0x126   :  { %v443_v48 = vmax.f32 %v404_v44, 0.0 }
 0x127   :  { %v460_v49 = vpack.c.bf16 %v442_v46, %v440_v45 }
 0x128   :  { %v461_v50 = vpack.c.bf16 %v443_v48, %v441_v47  ;;  %v407_v51 = vpop.f32.mrb[28].mxu0 }
 0x129   :  { %v408_v52 = vadd.f32 %v407_v51, %v1592_v9  ;;  %v409_v53 = vpop.f32.mrb[29].mxu0 }
 0x12a   :  { %v410_v54 = vadd.f32 %v409_v53, %v1596_v11  ;;  %v411_v55 = vpop.f32.mrb[30].mxu0  ;;  %760 = vmatprep.mubr.bf16.mxu1 %v461_v50 }
 0x12b   :  { %v412_v1 = vadd.f32 %v411_v55, %v1592_v9  ;;  %v413_v10 = vpop.f32.mrb[31].mxu0  ;;  %761 = vmatmul.mubr.bf16.gmra.mrb[24].mxu1 %v460_v49  ;;  %v444_v57 = vmax.f32 %v408_v52, 0.0  ;;  %v1317_v9 = vld [vmem:[%s1690_s5 + $0x38] sm:$0xff]  }
 0x12c   :  { %v414_v56 = vadd.f32 %v413_v10, %v1596_v11  ;;  %v445_v59 = vmax.f32 %v410_v54, 0.0  ;;  %1195 = vmatpush3.bf16.msra.mxu0 %v1317_v9  ;;  %v496_v11 = vld [vmem:[%s1689_s4] sm:$0x3] }
 0x12d   :  { %v446_v58 = vmax.f32 %v412_v1, 0.0  ;;  %v1641_v0 = vrot.slane %v496_v11, %v80_v6  ;;  %v1645_v2 = vrot.slane %v496_v11, %v84_v8 }
 0x12e   :  { %v447_v60 = vmax.f32 %v414_v56, 0.0 }
 0x12f   :  { %v462_v61 = vpack.c.bf16 %v446_v58, %v444_v57 }
 0x130   :  { %v463_v62 = vpack.c.bf16 %v447_v60, %v445_v59 }
 0x132   :  { %770 = vmatprep.mubr.bf16.mxu1 %v463_v62 }
 0x133   :  { %771 = vmatmul.mubr.bf16.gmra.mrb[28].mxu1 %v462_v61 }
 0x1ce   :  { %v702_v3 = vpop.f32.mrb[0].mxu1 }
 0x1cf   :  { %v703_v5 = vadd.f32 %v702_v3, %v1641_v0  ;;  %v704_v7 = vpop.f32.mrb[1].mxu1 }
 0x1d0   :  { %v705_v12 = vadd.f32 %v704_v7, %v1645_v2  ;;  %v706_v13 = vpop.f32.mrb[2].mxu1 }
 0x1d1   :  { %v707_v14 = vadd.f32 %v706_v13, %v1641_v0  ;;  %v708_v15 = vpop.f32.mrb[3].mxu1  ;;  %v781_v17 = vmax.f32 %v703_v5, 0.0 }
 0x1d2   :  { %v709_v16 = vadd.f32 %v708_v15, %v1645_v2  ;;  %v782_v6 = vmax.f32 %v705_v12, 0.0 }
 0x1d3   :  { %v783_v18 = vmax.f32 %v707_v14, 0.0 }
 0x1d4   :  { %v784_v19 = vmax.f32 %v709_v16, 0.0 }
 0x1d5   :  { %v813_v20 = vpack.c.bf16 %v783_v18, %v781_v17 }
 0x1d6   :  { %v814_v4 = vpack.c.bf16 %v784_v19, %v782_v6  ;;  %v712_v8 = vpop.f32.mrb[4].mxu1 }
 0x1d7   :  { %v713_v21 = vadd.f32 %v712_v8, %v1641_v0  ;;  %v714_v22 = vpop.f32.mrb[5].mxu1 }
 0x1d8   :  { %v715_v23 = vadd.f32 %v714_v22, %v1645_v2  ;;  %v716_v24 = vpop.f32.mrb[6].mxu1  ;;  %996 = vmatprep.mubr.bf16.mxu0 %v814_v4 }
 0x1d9   :  { %v717_v25 = vadd.f32 %v716_v24, %v1641_v0  ;;  %v718_v26 = vpop.f32.mrb[7].mxu1  ;;  %997 = vmatmul.mubr.bf16.vlgmr.msra.gmra.mrb[32].mxu0 %v813_v20  ;;  %v785_v28 = vmax.f32 %v713_v21, 0.0 }
 0x1da   :  { %v719_v27 = vadd.f32 %v718_v26, %v1645_v2  ;;  %v786_v30 = vmax.f32 %v715_v23, 0.0 }
 0x1db   :  { %v787_v29 = vmax.f32 %v717_v25, 0.0 }
 0x1dc   :  { %v788_v31 = vmax.f32 %v719_v27, 0.0 }
 0x1dd   :  { %v815_v32 = vpack.c.bf16 %v787_v29, %v785_v28 }
 0x1de   :  { %v816_v33 = vpack.c.bf16 %v788_v31, %v786_v30  ;;  %v722_v34 = vpop.f32.mrb[8].mxu1 }
 0x1df   :  { %v723_v35 = vadd.f32 %v722_v34, %v1641_v0  ;;  %v724_v36 = vpop.f32.mrb[9].mxu1 }
 0x1e0   :  { %v725_v37 = vadd.f32 %v724_v36, %v1645_v2  ;;  %v726_v38 = vpop.f32.mrb[10].mxu1  ;;  %1004 = vmatprep.mubr.bf16.mxu0 %v816_v33 }
 0x1e1   :  { %v727_v39 = vadd.f32 %v726_v38, %v1641_v0  ;;  %v728_v40 = vpop.f32.mrb[11].mxu1  ;;  %1005 = vmatmul.mubr.bf16.gmra.mrb[36].mxu0 %v815_v32  ;;  %v789_v42 = vmax.f32 %v723_v35, 0.0 }
 0x1e2   :  { %v729_v41 = vadd.f32 %v728_v40, %v1645_v2  ;;  %v790_v44 = vmax.f32 %v725_v37, 0.0 }
 0x1e3   :  { %v791_v43 = vmax.f32 %v727_v39, 0.0 }
 0x1e4   :  { %v792_v45 = vmax.f32 %v729_v41, 0.0 }
 0x1e5   :  { %v817_v46 = vpack.c.bf16 %v791_v43, %v789_v42 }
 0x1e6   :  { %v818_v47 = vpack.c.bf16 %v792_v45, %v790_v44  ;;  %v732_v48 = vpop.f32.mrb[12].mxu1 }
 0x1e7   :  { %v733_v49 = vadd.f32 %v732_v48, %v1641_v0  ;;  %v734_v50 = vpop.f32.mrb[13].mxu1 }
 0x1e8   :  { %v735_v51 = vadd.f32 %v734_v50, %v1645_v2  ;;  %v736_v52 = vpop.f32.mrb[14].mxu1  ;;  %1012 = vmatprep.mubr.bf16.mxu0 %v818_v47 }
 0x1e9   :  { %v737_v53 = vadd.f32 %v736_v52, %v1641_v0  ;;  %v738_v54 = vpop.f32.mrb[15].mxu1  ;;  %1013 = vmatmul.mubr.bf16.gmra.mrb[40].mxu0 %v817_v46  ;;  %v793_v1 = vmax.f32 %v733_v49, 0.0 }
 0x1ea   :  { %v739_v55 = vadd.f32 %v738_v54, %v1645_v2  ;;  %v794_v56 = vmax.f32 %v735_v51, 0.0 }
 0x1eb   :  { %v795_v10 = vmax.f32 %v737_v53, 0.0 }
 0x1ec   :  { %v796_v57 = vmax.f32 %v739_v55, 0.0 }
 0x1ed   :  { %v819_v58 = vpack.c.bf16 %v795_v10, %v793_v1  ;;  %v1163_v10 = vld [vmem:[%s1691_s6] ss:$0 sm:$0xff] }
 0x1ee   :  { %v820_v59 = vpack.c.bf16 %v796_v57, %v794_v56  ;;  %v742_v60 = vpop.f32.mrb[16].mxu1 }
 0x1ef   :  { %v743_v61 = vadd.f32 %v742_v60, %v1641_v0  ;;  %v744_v62 = vpop.f32.mrb[17].mxu1 }
 0x1f0   :  { %v745_v63 = vadd.f32 %v744_v62, %v1645_v2  ;;  %v746_v9 = vpop.f32.mrb[18].mxu1  ;;  %1020 = vmatprep.mubr.bf16.mxu0 %v820_v59 }
 0x1f1   :  { %v747_v11 = vadd.f32 %v746_v9, %v1641_v0  ;;  %v748_v3 = vpop.f32.mrb[19].mxu1  ;;  %1021 = vmatmul.mubr.bf16.gmra.mrb[44].mxu0 %v819_v58  ;;  %v797_v7 = vmax.f32 %v743_v61, 0.0 }
 0x1f2   :  { %v749_v5 = vadd.f32 %v748_v3, %v1645_v2  ;;  %v798_v13 = vmax.f32 %v745_v63, 0.0 }
 0x1f3   :  { %v799_v12 = vmax.f32 %v747_v11, 0.0 }
 0x1f4   :  { %v800_v14 = vmax.f32 %v749_v5, 0.0 }
 0x1f5   :  { %v821_v15 = vpack.c.bf16 %v799_v12, %v797_v7 }
 0x1f6   :  { %v822_v16 = vpack.c.bf16 %v800_v14, %v798_v13  ;;  %v752_v17 = vpop.f32.mrb[20].mxu1 }
 0x1f7   :  { %v753_v18 = vadd.f32 %v752_v17, %v1641_v0  ;;  %v754_v6 = vpop.f32.mrb[21].mxu1 }
 0x1f8   :  { %v755_v19 = vadd.f32 %v754_v6, %v1645_v2  ;;  %v756_v20 = vpop.f32.mrb[22].mxu1  ;;  %1028 = vmatprep.mubr.bf16.mxu0 %v822_v16 }
 0x1f9   :  { %v757_v4 = vadd.f32 %v756_v20, %v1641_v0  ;;  %v758_v8 = vpop.f32.mrb[23].mxu1  ;;  %1029 = vmatmul.mubr.bf16.gmra.mrb[48].mxu0 %v821_v15  ;;  %v801_v22 = vmax.f32 %v753_v18, 0.0 }
 0x1fa   :  { %v759_v21 = vadd.f32 %v758_v8, %v1645_v2  ;;  %v802_v24 = vmax.f32 %v755_v19, 0.0 }
 0x1fb   :  { %v803_v23 = vmax.f32 %v757_v4, 0.0 }
 0x1fc   :  { %v804_v25 = vmax.f32 %v759_v21, 0.0 }
 0x1fd   :  { %v823_v26 = vpack.c.bf16 %v803_v23, %v801_v22 }
 0x1fe   :  { %v824_v27 = vpack.c.bf16 %v804_v25, %v802_v24  ;;  %v762_v28 = vpop.f32.mrb[24].mxu1 }
 0x1ff   :  { %v763_v29 = vadd.f32 %v762_v28, %v1641_v0  ;;  %v764_v30 = vpop.f32.mrb[25].mxu1 }
 0x200   :  { %v765_v31 = vadd.f32 %v764_v30, %v1645_v2  ;;  %v766_v32 = vpop.f32.mrb[26].mxu1  ;;  %1036 = vmatprep.mubr.bf16.mxu0 %v824_v27 }
 0x201   :  { %v767_v33 = vadd.f32 %v766_v32, %v1641_v0  ;;  %v768_v34 = vpop.f32.mrb[27].mxu1  ;;  %1037 = vmatmul.mubr.bf16.gmra.mrb[52].mxu0 %v823_v26  ;;  %v805_v36 = vmax.f32 %v763_v29, 0.0 }
 0x202   :  { %v769_v35 = vadd.f32 %v768_v34, %v1645_v2  ;;  %v806_v38 = vmax.f32 %v765_v31, 0.0 }
 0x203   :  { %v807_v37 = vmax.f32 %v767_v33, 0.0 }
 0x204   :  { %v808_v39 = vmax.f32 %v769_v35, 0.0 }
 0x205   :  { %v825_v40 = vpack.c.bf16 %v807_v37, %v805_v36 }
 0x206   :  { %v826_v41 = vpack.c.bf16 %v808_v39, %v806_v38  ;;  %v772_v42 = vpop.f32.mrb[28].mxu1 }
 0x207   :  { %v773_v43 = vadd.f32 %v772_v42, %v1641_v0  ;;  %v774_v44 = vpop.f32.mrb[29].mxu1 }
 0x208   :  { %v775_v45 = vadd.f32 %v774_v44, %v1645_v2  ;;  %v776_v46 = vpop.f32.mrb[30].mxu1  ;;  %1044 = vmatprep.mubr.bf16.mxu0 %v826_v41 }
 0x209   :  { %v777_v47 = vadd.f32 %v776_v46, %v1641_v0  ;;  %v778_v48 = vpop.f32.mrb[31].mxu1  ;;  %1045 = vmatmul.mubr.bf16.gmra.mrb[56].mxu0 %v825_v40  ;;  %v809_v50 = vmax.f32 %v773_v43, 0.0 }
 0x20a   :  { %v779_v49 = vadd.f32 %v778_v48, %v1645_v2  ;;  %v810_v52 = vmax.f32 %v775_v45, 0.0 }
 0x20b   :  { %v811_v51 = vmax.f32 %v777_v47, 0.0 }
 0x20c   :  { %v812_v53 = vmax.f32 %v779_v49, 0.0 }
 0x20d   :  { %v827_v54 = vpack.c.bf16 %v811_v51, %v809_v50 }
 0x20e   :  { %v828_v55 = vpack.c.bf16 %v812_v53, %v810_v52 }
 0x210   :  { %1052 = vmatprep.mubr.bf16.mxu0 %v828_v55 }
 0x211   :  { %1053 = vmatmul.mubr.bf16.gmra.mrb[60].mxu0 %v827_v54 }
 0x2ac   :  { %v1196_v1 = vpop.f32.mrb[32].mxu0 }
 0x2ad   :  { %v1197_v56 = vpop.f32.mrb[33].mxu0 }
 0x2ae   :  { %v1198_v57 = vadd.f32 %v1197_v56, %v1196_v1  ;;  %v1199_v0 = vpop.f32.mrb[34].mxu0 }
 0x2af   :  { %v1200_v58 = vpop.f32.mrb[35].mxu0 }
 0x2b0   :  { %v999_v59 = vadd.f32 %v1198_v57, %v1163_v10 }
 0x2b2   :  { %1062 = vst.msk [vmem:[#allocation4] sm:$0xff] %vm1061_vm2, %v999_v59 }
 0x2b4   :  { %v1202_v2 = vpop.f32.mrb[36].mxu0 }
 0x2b5   :  { %v1203_v60 = vpop.f32.mrb[37].mxu0 }
 0x2b6   :  { %v1205_v61 = vpop.f32.mrb[38].mxu0 }
 0x2b7   :  { %v1206_v62 = vpop.f32.mrb[39].mxu0 }
 0x2b9   :  { %v1095_v63 = vld [vmem:[#allocation4] sm:$0xf] }
 0x2ba   :  { %1096 = vst [vmem:[%s1692_s7] sm:$0xf] %v1095_v63 }
 0x2bc   :  { %v1208_v9 = vpop.f32.mrb[40].mxu0 }
 0x2bd   :  { %v1209_v11 = vpop.f32.mrb[41].mxu0 }
 0x2be   :  { %v1211_v3 = vpop.f32.mrb[42].mxu0 }
 0x2bf   :  { %v1212_v5 = vpop.f32.mrb[43].mxu0 }
 0x2c4   :  { %v1214_v7 = vpop.f32.mrb[44].mxu0 }
 0x2c5   :  { %v1215_v12 = vpop.f32.mrb[45].mxu0 }
 0x2c6   :  { %v1217_v13 = vpop.f32.mrb[46].mxu0 }
 0x2c7   :  { %v1218_v14 = vpop.f32.mrb[47].mxu0 }
 0x2cc   :  { %v1220_v15 = vpop.f32.mrb[48].mxu0 }
 0x2cd   :  { %v1221_v16 = vpop.f32.mrb[49].mxu0 }
 0x2ce   :  { %v1223_v17 = vpop.f32.mrb[50].mxu0 }
 0x2cf   :  { %v1224_v18 = vpop.f32.mrb[51].mxu0 }
 0x2d4   :  { %v1226_v6 = vpop.f32.mrb[52].mxu0 }
 0x2d5   :  { %v1227_v19 = vpop.f32.mrb[53].mxu0 }
 0x2d6   :  { %v1229_v20 = vpop.f32.mrb[54].mxu0 }
 0x2d7   :  { %v1230_v4 = vpop.f32.mrb[55].mxu0 }
 0x2dc   :  { %v1232_v8 = vpop.f32.mrb[56].mxu0 }
 0x2dd   :  { %v1233_v21 = vpop.f32.mrb[57].mxu0 }
 0x2de   :  { %v1235_v22 = vpop.f32.mrb[58].mxu0 }
 0x2df   :  { %v1236_v23 = vpop.f32.mrb[59].mxu0 }
 0x2e4   :  { %v1238_v24 = vpop.f32.mrb[60].mxu0 }
 0x2e5   :  { %v1239_v25 = vpop.f32.mrb[61].mxu0 }
 0x2e6   :  { %v1241_v26 = vpop.f32.mrb[62].mxu0 }
 0x2e7   :  { %v1242_v27 = vpop.f32.mrb[63].mxu0 }
 0x2e8   :  { %1113 = vsyncpa [#allocation3], 1 }

</bundles_post_ra>
